<compile_context>
chip_gen: v7x
topology: tpu7x:2x2x1
jax: 0.10.0
libtpu: 0.0.40
codegen_flags: <defaults>
</compile_context>

<pallas_src>
import jax
import jax.numpy as jnp
from jax.experimental import pallas as pl
from jax.experimental.pallas import tpu as pltpu


def _layer_scale_kernel(x_ref, g_ref, o_ref):
    """x_ref: (TM, D), g_ref: (1, D), o_ref: (TM, D)."""
    # Pure VPU elementwise multiply with lane-broadcast of gamma.
    o_ref[...] = x_ref[...] * g_ref[...]


def _pick_block_rows(m, d, itemsize, vmem_tile_budget_bytes=8 << 20):
    """Largest row-tile TM that (a) divides M, (b) is a multiple of 8 (sublane),
    (c) keeps one (TM, D) tile under the per-buffer VMEM budget."""
    max_rows = max(8, vmem_tile_budget_bytes // max(1, d * itemsize))
    if m <= max_rows:
        return m                      # single/full block along rows is always legal
    start = 8 * (max_rows // 8)
    for tm in range(start, 0, -8):
        if m % tm == 0:
            return tm
    return m                          # fallback: one big block (still correct)


def layer_scale_pallas(x, gamma):
    """x: (..., D); gamma: (D,). Returns x * gamma with x's dtype and shape."""
    orig_shape = x.shape
    D = orig_shape[-1]
    assert gamma.shape == (D,), f"gamma must be shape ({D},), got {gamma.shape}"

    M = 1
    for s in orig_shape[:-1]:
        M *= s
    x2 = x.reshape(M, D)                      # row-major flatten, no data movement
    g2 = gamma.reshape(1, D).astype(x.dtype)  # (1, D) block, broadcast in-kernel

    TM = _pick_block_rows(M, D, x2.dtype.itemsize)
    grid = (M // TM,) if M % TM == 0 else (pl.cdiv(M, TM),)

    out = pl.pallas_call(
        _layer_scale_kernel,
        out_shape=jax.ShapeDtypeStruct((M, D), x.dtype),
        grid_spec=pl.GridSpec(
            grid=grid,
            in_specs=[
                pl.BlockSpec((TM, D), lambda i: (i, 0)),   # big row tile of x
                pl.BlockSpec((1, D), lambda i: (0, 0)),    # gamma, same block every step
            ],
            out_specs=pl.BlockSpec((TM, D), lambda i: (i, 0)),
        ),
        compiler_params=pltpu.CompilerParams(
            dimension_semantics=("parallel",),   # shard grid steps across TCs (v7x)
            vmem_limit_bytes=48 << 20,           # stays inside v7x's 64 MiB VMEM
        ),
    )(x2, g2)
    return out.reshape(orig_shape)


def layer_scale_reference(x, gamma):
    return x * gamma


if __name__ == "__main__":
    # Small shapes implied by the forward: x (B, N, D) tokens, gamma (D,).
    # D chosen as a multiple of 128 so loads/stores are lane-dense.
    B, N, D = 2, 16, 256
    init_values = 1e-5

    key = jax.random.PRNGKey(0)
    kx, kg = jax.random.split(key)
    x = jax.random.normal(kx, (B, N, D), dtype=jnp.float32)
    # A "trained" LayerScale parameter (initialized at init_values, perturbed so
    # the correctness check is non-trivial).
    gamma = init_values * jnp.ones((D,), dtype=jnp.float32) \
        + 0.1 * jax.random.normal(kg, (D,), dtype=jnp.float32)

    out = layer_scale_pallas(x, gamma)
    out = jax.block_until_ready(out)

    ref = layer_scale_reference(x, gamma)
    assert out.shape == x.shape
    assert out.dtype == x.dtype
    assert jnp.allclose(out, ref, atol=1e-6, rtol=1e-6), "mismatch vs reference"

    # TODO(synk): `inplace=True` (x.mul_) has no in-place semantics in JAX; the
    # functional output above is numerically identical.
    print("KERNEL_OK")
</pallas_src>

<mosaic_0001>
module attributes {stable_mosaic.version = 11 : i64} {
  func.func @_layer_scale_kernel(%arg0: i32, %arg1: memref<32x256xf32, #tpu.memory_space<vmem>>, %arg2: memref<1x256xf32, #tpu.memory_space<vmem>>, %arg3: memref<32x256xf32, #tpu.memory_space<vmem>>) attributes {dimension_semantics = [#tpu.dimension_semantics<parallel>], iteration_bounds = array<i64: 1>, scalar_prefetch = 0 : i64, scratch_operands = 0 : i64, tpu.core_type = #tpu.core_type<tc>, window_params = [{transform_indices = @transform_0, window_bounds = array<i64: 32, 256>}, {pipeline_mode = #tpu.pipeline_mode<synchronous>, transform_indices = @transform_1, window_bounds = array<i64: 1, 256>}, {transform_indices = @transform_2, window_bounds = array<i64: 32, 256>}]} {
    %c0 = arith.constant 0 : index
    %c0_0 = arith.constant 0 : index
    %0 = vector.load %arg1[%c0, %c0_0] : memref<32x256xf32, #tpu.memory_space<vmem>>, vector<32x256xf32>
    %c0_1 = arith.constant 0 : index
    %c0_2 = arith.constant 0 : index
    %1 = vector.load %arg2[%c0_1, %c0_2] : memref<1x256xf32, #tpu.memory_space<vmem>>, vector<1x256xf32>
    %2 = vector.broadcast %1 : vector<1x256xf32> to vector<32x256xf32>
    %3 = arith.mulf %0, %2 : vector<32x256xf32>
    %c0_3 = arith.constant 0 : index
    %c0_4 = arith.constant 0 : index
    %4 = vector.load %arg3[%c0_3, %c0_4] : memref<32x256xf32, #tpu.memory_space<vmem>>, vector<32x256xf32>
    tpu.vector_store %arg3[%c0_3, %c0_4], %3 {strides = array<i32>} : memref<32x256xf32, #tpu.memory_space<vmem>>, vector<32x256xf32>,
    return
  }
  func.func @transform_0(%arg0: i32) -> (i32, i32) {
    %c0_i32 = arith.constant 0 : i32
    %c0_i32_0 = arith.constant 0 : i32
    return %arg0, %c0_i32 : i32, i32
  }
  func.func @transform_1(%arg0: i32) -> (i32, i32) {
    %c0_i32 = arith.constant 0 : i32
    %c0_i32_0 = arith.constant 0 : i32
    %c0_i32_1 = arith.constant 0 : i32
    return %c0_i32, %c0_i32_0 : i32, i32
  }
  func.func @transform_2(%arg0: i32) -> (i32, i32) {
    %c0_i32 = arith.constant 0 : i32
    %c0_i32_0 = arith.constant 0 : i32
    return %arg0, %c0_i32 : i32, i32
  }
}

</mosaic_0001>

<bundles_post_ra>
// kernel: tpu_custom_call.1
= control target key start
LH: loop header
LB: loop body
LE: loop exit
PB: predicated region body
PF: predicated region fallthrough
CT: control target
= control target key end

     0   :  { %7 = vsyncpa [#allocation3], 0  ;;  %s183_s0 = inlined_call_operand.hbm [shape: f32[32,256], index: 0, kind: input, shape index: {}]   ;;  %s184_s1 = inlined_call_operand.vmem [shape: f32[1,256], index: 1, kind: input, shape index: {}]   ;;  %s185_s2 = inlined_call_operand.hbm [shape: f32[32,256], index: 2, kind: output, shape index: {}]  }
   0x1   :  { %8 = vsyncpa [#allocation4], 0  ;;  %s131_s9 = smov [#allocation2]   ;;  %s83_s13 = scalar_lea.hbm %s183_s0, 1024 }
   0x2   :  { %s14_s10 = sshll.u32 %s131_s9, 4  ;;  %p84_p0 = scmp.ne.s32.totalorder %s183_s0, %s83_s13  ;;  %s15_s10 = int_to_ptr.vmem [resolvable:$true] %s14_s10 }
   0x3   :  { %p87_p1 = scmp.lt.u32.totalorder %s83_s13, %s183_s0 }
   0x5   :  { %p89_p2 = pnand %p87_p1, %p84_p0 }
   0x7   :  { %92 = shalt.err (!%p89_p2)
}
   0x8   :  { %s93_s18 = scalar_lea.vmem %s15_s10, 1024  ;;  %p98_p4 = scmp.lt.s32.totalorder %s15_s10, %s15_s10 }
   0x9   :  { %p94_p3 = scmp.ne.s32.totalorder %s15_s10, %s93_s18  ;;  %p99_p5 = scmp.lt.s32.totalorder %s93_s18, %s93_s18 }
   0xb   :  { %p100_p6 = por %p99_p5, %p98_p4 }
   0xd   :  { %p101_p7 = pnand %p100_p6, %p94_p3 }
   0xf   :  { %104 = shalt.err (!%p101_p7)
}
  0x10   :  { %s132_s19 = smov 256   ;;  %s133_s20 = smov 16  }
  0x11   :  { %20 = dma.hbm_to_vmem [thread:$0]  %s183_s0, 1024, %s15_s10, [#allocation3], %s132_s19, %s132_s19, %s133_s20  }
  0x12   :  { %127 = dma.done.wait [#allocation3], 1024  }
  0x13   :  { %128 = vsyncadd [#allocation3], 4294966272  ;;  %v36_v0 = vlaneseq  ;;  %v26_v4 = vld [vmem:[#allocation2] sm:$0xff]  ;;  %v27_v6 = vld [vmem:[#allocation2 + $0x8] sm:$0xff]  ;;  %s134_s25 = smov [#allocation5]  }
  0x14   :  { %v34_v5 = vld [vmem:[%s184_s1] sm:$0x3]  ;;  %v28_v9 = vld [vmem:[#allocation2 + $0x10] sm:$0xff]  ;;  %v29_v10 = vld [vmem:[#allocation2 + $0x18] sm:$0xff]  ;;  %s67_s26 = sshll.u32 %s134_s25, 4  ;;  %s68_s26 = int_to_ptr.vmem [resolvable:$true] %s67_s26 }
  0x15   :  { %v37_v1 = vshrl.u32 %v36_v0, 7  ;;  %v30_v11 = vld [vmem:[#allocation2 + $0x20] sm:$0xff]  ;;  %v31_v12 = vld [vmem:[#allocation2 + $0x28] sm:$0xff]  ;;  %v32_v13 = vld [vmem:[#allocation2 + $0x30] sm:$0xff]  ;;  %s105_s0 = scalar_lea.vmem %s68_s26, 1024  ;;  %p110_p9 = scmp.lt.s32.totalorder %s68_s26, %s68_s26 }
  0x16   :  { %v33_v14 = vld [vmem:[#allocation2 + $0x38] sm:$0xff]  ;;  %p106_p8 = scmp.ne.s32.totalorder %s68_s26, %s105_s0  ;;  %p111_p10 = scmp.lt.s32.totalorder %s105_s0, %s105_s0 }
  0x17   :  { %v38_v2 = vsub.s32 0, %v37_v1  ;;  %v42_v3 = vsub.s32 1, %v37_v1 }
  0x18   :  { %p112_p11 = por %p111_p10, %p110_p9 }
  0x19   :  { %v39_v7 = vrot.slane %v34_v5, %v38_v2  ;;  %v43_v8 = vrot.slane %v34_v5, %v42_v3 }
  0x1a   :  { %p113_p12 = pnand %p112_p11, %p106_p8 }
  0x1b   :  { %v46_v15 = vmul.f32 %v39_v7, %v26_v4  ;;  %v47_v16 = vmul.f32 %v43_v8, %v27_v6  ;;  %v48_v17 = vmul.f32 %v39_v7, %v28_v9  ;;  %v49_v18 = vmul.f32 %v43_v8, %v29_v10 }
  0x1c   :  { %v50_v19 = vmul.f32 %v39_v7, %v30_v11  ;;  %v51_v20 = vmul.f32 %v43_v8, %v31_v12  ;;  %v52_v21 = vmul.f32 %v39_v7, %v32_v13  ;;  %v53_v22 = vmul.f32 %v43_v8, %v33_v14 }
  0x1d   :  { %54 = vst [vmem:[#allocation5] sm:$0xff] %v46_v15  ;;  %55 = vst [vmem:[#allocation5 + $0x8] sm:$0xff] %v47_v16 }
  0x1e   :  { %56 = vst [vmem:[#allocation5 + $0x10] sm:$0xff] %v48_v17  ;;  %57 = vst [vmem:[#allocation5 + $0x18] sm:$0xff] %v49_v18 }
  0x1f   :  { %58 = vst [vmem:[#allocation5 + $0x20] sm:$0xff] %v50_v19  ;;  %59 = vst [vmem:[#allocation5 + $0x28] sm:$0xff] %v51_v20 }
  0x20   :  { %60 = vst [vmem:[#allocation5 + $0x30] sm:$0xff] %v52_v21  ;;  %61 = vst [vmem:[#allocation5 + $0x38] sm:$0xff] %v53_v22 }
  0x21   :  { %116 = shalt.err (!%p113_p12)
}
  0x22   :  { %s117_s28 = scalar_lea.hbm %s185_s2, 1024 }
  0x23   :  { %p118_p13 = scmp.ne.s32.totalorder %s185_s2, %s117_s28  ;;  %p121_p0 = scmp.lt.u32.totalorder %s117_s28, %s185_s2 }
  0x25   :  { %p123_p1 = pnand %p121_p0, %p118_p13 }
  0x27   :  { %126 = shalt.err (!%p123_p1)
}
  0x28   :  { %73 = dma.vmem_to_hbm [thread:$0]  %s68_s26, 1024, %s185_s2, [#allocation4], %s132_s19, %s132_s19, %s133_s20  }
  0x29   :  { %129 = dma.done.wait [#allocation4], 1024  }
  0x2a   :  { %130 = vsyncadd [#allocation4], 4294966272 }
  0x2b   :  { %77 = vsyncpa [#allocation3], 1 }
  0x2c   :  { %78 = vsyncpa [#allocation4], 1 }

</bundles_post_ra>
